<compile_context>
chip_gen: v7x
topology: tpu7x:2x2x1
jax: 0.10.0
libtpu: 0.0.40
codegen_flags: <defaults>
</compile_context>

<pallas_src>
import jax
import jax.numpy as jnp
from jax.experimental import pallas as pl
from jax.experimental.pallas import tpu as pltpu


def _ctg_kernel(x_ref, a_ref, w_ref, bcols_ref, o_ref):
    # x_ref     : (Nb, C_in, TV)   batch block, (T, V) flattened on the lane axis
    # a_ref     : (TV, TV)         block-diagonal adjacency (exact zeros off-diag)
    # w_ref     : (C_out, C_in)    1x1-conv weight
    # bcols_ref : (C_out, TV)      b[:, None] * (1^T A_bd)   (f32)
    # o_ref     : (Nb, C_out, TV)
    Nb, C_in, TV = x_ref.shape
    C_out = w_ref.shape[0]

    # Graph conv first (reassociated): one big lane-dense MXU matmul whose M
    # dimension is the free contiguous flatten Nb*C_in.
    x2 = x_ref[...].reshape(Nb * C_in, TV)
    z = jnp.dot(x2, a_ref[...], preferred_element_type=jnp.float32)
    z = z.reshape(Nb, C_in, TV)

    # Channel mix (tiny K = C_in) as a batched matmul with no transposes, plus
    # the bias folded through the adjacency:  W (x A_bd) + b (1^T A_bd).
    w = jnp.broadcast_to(w_ref[...].astype(jnp.float32), (Nb, C_out, C_in))
    out = jax.lax.dot_general(
        w, z, (((2,), (1,)), ((0,), (0,))),
        preferred_element_type=jnp.float32)              # (Nb, C_out, TV)
    out = out + bcols_ref[...][None]

    o_ref[...] = out.astype(o_ref.dtype)


def build_block_adjacency(A):
    """Block-diagonal adjacency: A_bd[(t,v),(s,w)] = A[t,v,w] if t == s else 0.

    Hoisted out of the layer call: Social-STGCNN reuses the same A for every
    layer, so build this once per forward and pass it to each layer.
    """
    T, V, _ = A.shape
    eye = jnp.eye(T, dtype=A.dtype)
    return jnp.einsum('ts,tvw->tvsw', eye, A).reshape(T * V, T * V)


def conv_temporal_graphical(x, A, W, b, *, A_bd=None, compute_dtype=None,
                            num_blocks=None):
    """Pallas forward of ConvTemporalGraphical (t_kernel_size == 1).

    x: (N, C_in, T, V); A: (K == T, V, V); W: (C_out, C_in); b: (C_out,).
    A_bd: optional precomputed build_block_adjacency(A).
    compute_dtype: dtype of the MXU operands (jnp.bfloat16 recommended on
      v6e/v7x); accumulation is always f32; output keeps x.dtype.
    Returns (out, A) with out: (N, C_out, T, V), matching the PyTorch module.
    """
    N, C_in, T, V = x.shape
    K = A.shape[0]
    assert K == T, "einsum 'nctv,tvw->nctw' requires A.shape[0] == T"
    C_out = W.shape[0]
    TV = T * V

    if A_bd is None:
        A_bd = build_block_adjacency(A)
    if num_blocks is None:
        # Two blocks when possible so v7x's two TensorCores both get work;
        # otherwise the whole batch in a single grid step.
        num_blocks = 2 if (N >= 2 and N % 2 == 0) else 1
    assert N % num_blocks == 0
    Nb = N // num_blocks

    cdt = compute_dtype if compute_dtype is not None else x.dtype
    out_dtype = x.dtype

    # Free contiguous reshape (no transpose): (T, V) merged onto the lane axis.
    x_flat = x.reshape(N, C_in, TV).astype(cdt)
    A_in = A_bd.astype(cdt)
    W_in = W.astype(cdt)
    # Bias folded through the adjacency (kept in f32):
    #   (W x + b 1^T) A_bd == W (x A_bd) + b (1^T A_bd)
    b_cols = (b[:, None].astype(jnp.float32)
              * jnp.sum(A_bd, axis=0).astype(jnp.float32)[None, :])

    isz = jnp.dtype(cdt).itemsize
    vmem_est = (2 * Nb * C_in * TV * isz
                + 2 * Nb * C_out * TV * jnp.dtype(out_dtype).itemsize
                + 2 * (TV * TV * isz + C_out * C_in * isz + C_out * TV * 4))
    vmem_limit = int(min(max(2 * vmem_est, 32 * 1024 * 1024), 64 * 1024 * 1024))

    def make_call(single_buffer_constants):
        # Grid-invariant operands never change across n -> single-buffer them.
        const_kw = (dict(pipeline_mode=pl.Buffered(1))
                    if single_buffer_constants else {})
        return pl.pallas_call(
            _ctg_kernel,
            out_shape=jax.ShapeDtypeStruct((N, C_out, TV), out_dtype),
            grid_spec=pltpu.PrefetchScalarGridSpec(
                num_scalar_prefetch=0,
                grid=(num_blocks,),
                in_specs=[
                    pl.BlockSpec((Nb, C_in, TV), lambda n: (n, 0, 0)),
                    pl.BlockSpec((TV, TV), lambda n: (0, 0), **const_kw),
                    pl.BlockSpec((C_out, C_in), lambda n: (0, 0), **const_kw),
                    pl.BlockSpec((C_out, TV), lambda n: (0, 0), **const_kw),
                ],
                out_specs=pl.BlockSpec((Nb, C_out, TV), lambda n: (n, 0, 0)),
            ),
            compiler_params=pltpu.CompilerParams(
                dimension_semantics=("parallel",),
                vmem_limit_bytes=vmem_limit),
        )

    try:
        out_flat = make_call(True)(x_flat, A_in, W_in, b_cols)
    except Exception:
        # Fallback if this jax build rejects pipeline_mode=pl.Buffered(1);
        # double-buffered constants cost only a little extra VMEM at this scale.
        out_flat = make_call(False)(x_flat, A_in, W_in, b_cols)

    out = out_flat.reshape(N, C_out, T, V)   # free contiguous split of lanes
    return out, A


if __name__ == "__main__":
    # Small shapes consistent with the module: N=2, C_in=4, C_out=8, T=K=8, V=16.
    N, C_in, C_out, T, V = 2, 4, 8, 8, 16
    key = jax.random.PRNGKey(0)
    kx, ka, kw, kb = jax.random.split(key, 4)

    x = jax.random.normal(kx, (N, C_in, T, V), dtype=jnp.float32)
    A = jax.random.normal(ka, (T, V, V), dtype=jnp.float32)
    W = jax.random.normal(kw, (C_out, C_in), dtype=jnp.float32) * 0.1
    b = jax.random.normal(kb, (C_out,), dtype=jnp.float32) * 0.1

    # Pure-JAX reference (matches the PyTorch forward).
    y_ref = jnp.einsum('oc,nctv->notv', W, x) + b[None, :, None, None]
    ref = jnp.einsum('nctv,tvw->nctw', y_ref, A)

    # Hoisted once per forward, shared across all st-gcn layers.
    A_bd = build_block_adjacency(A)

    # f32 path (v5e, or when exact parity with the f32 reference is needed).
    out, A_out = conv_temporal_graphical(x, A, W, b, A_bd=A_bd)
    out = jax.block_until_ready(out)
    assert out.shape == (N, C_out, T, V)
    assert jnp.allclose(out, ref, atol=1e-4, rtol=1e-4)
    assert jnp.array_equal(A_out, A)

    # bf16 MXU-operand path (preferred on v6e/v7x); accumulation stays f32.
    out_bf16, _ = conv_temporal_graphical(x, A, W, b, A_bd=A_bd,
                                          compute_dtype=jnp.bfloat16)
    out_bf16 = jax.block_until_ready(out_bf16)
    assert jnp.allclose(out_bf16, ref, atol=3e-2, rtol=3e-2)

    print("KERNEL_OK")
</pallas_src>

<mosaic_0001>
module attributes {stable_mosaic.version = 11 : i64} {
  func.func @_ctg_kernel(%arg0: i32, %arg1: memref<1x4x128xf32, #tpu.memory_space<vmem>>, %arg2: memref<128x128xf32, #tpu.memory_space<vmem>>, %arg3: memref<8x4xf32, #tpu.memory_space<vmem>>, %arg4: memref<8x128xf32, #tpu.memory_space<vmem>>, %arg5: memref<1x8x128xf32, #tpu.memory_space<vmem>>) attributes {dimension_semantics = [#tpu.dimension_semantics<parallel>], iteration_bounds = array<i64: 2>, scalar_prefetch = 0 : i64, scratch_operands = 0 : i64, tpu.core_type = #tpu.core_type<tc>, window_params = [{transform_indices = @transform_0, window_bounds = array<i64: 1, 4, 128>}, {pipeline_mode = #tpu.pipeline_mode<synchronous>, transform_indices = @transform_1, window_bounds = array<i64: 128, 128>}, {pipeline_mode = #tpu.pipeline_mode<synchronous>, transform_indices = @transform_2, window_bounds = array<i64: 8, 4>}, {pipeline_mode = #tpu.pipeline_mode<synchronous>, transform_indices = @transform_3, window_bounds = array<i64: 8, 128>}, {transform_indices = @transform_4, window_bounds = array<i64: 1, 8, 128>}]} {
    %c0 = arith.constant 0 : index
    %c0_0 = arith.constant 0 : index
    %c0_1 = arith.constant 0 : index
    %0 = vector.load %arg1[%c0, %c0_0, %c0_1] : memref<1x4x128xf32, #tpu.memory_space<vmem>>, vector<1x4x128xf32>
    %1 = vector.shape_cast %0 : vector<1x4x128xf32> to vector<4x128xf32>
    %c0_2 = arith.constant 0 : index
    %c0_3 = arith.constant 0 : index
    %2 = vector.load %arg2[%c0_2, %c0_3] : memref<128x128xf32, #tpu.memory_space<vmem>>, vector<128x128xf32>
    %cst = arith.constant dense<0.000000e+00> : vector<4x128xf32>
    %3 = tpu.matmul %1, %2, %cst {dimension_numbers = #tpu.dot_dimension_numbers<[1], [0], [0], [1], [0, 0, 1, 1], [], []>} : vector<4x128xf32>, vector<128x128xf32>, vector<4x128xf32> -> vector<4x128xf32>
    %4 = vector.shape_cast %3 : vector<4x128xf32> to vector<1x4x128xf32>
    %c0_4 = arith.constant 0 : index
    %c0_5 = arith.constant 0 : index
    %5 = vector.load %arg3[%c0_4, %c0_5] : memref<8x4xf32, #tpu.memory_space<vmem>>, vector<8x4xf32>
    %6 = vector.shape_cast %5 : vector<8x4xf32> to vector<1x8x4xf32>
    %cst_6 = arith.constant dense<0.000000e+00> : vector<1x8x128xf32>
    %7 = tpu.matmul %6, %4, %cst_6 {dimension_numbers = #tpu.dot_dimension_numbers<[2], [1], [1], [2], [0, 0, 0, 1, 1, 2], [0], [0]>} : vector<1x8x4xf32>, vector<1x4x128xf32>, vector<1x8x128xf32> -> vector<1x8x128xf32>
    %c0_7 = arith.constant 0 : index
    %c0_8 = arith.constant 0 : index
    %8 = vector.load %arg4[%c0_7, %c0_8] : memref<8x128xf32, #tpu.memory_space<vmem>>, vector<8x128xf32>
    %9 = vector.shape_cast %8 : vector<8x128xf32> to vector<1x8x128xf32>
    %10 = arith.addf %7, %9 : vector<1x8x128xf32>
    %c0_9 = arith.constant 0 : index
    %c0_10 = arith.constant 0 : index
    %c0_11 = arith.constant 0 : index
    %11 = vector.load %arg5[%c0_9, %c0_10, %c0_11] : memref<1x8x128xf32, #tpu.memory_space<vmem>>, vector<1x8x128xf32>
    tpu.vector_store %arg5[%c0_9, %c0_10, %c0_11], %10 {strides = array<i32>} : memref<1x8x128xf32, #tpu.memory_space<vmem>>, vector<1x8x128xf32>,
    return
  }
  func.func @transform_0(%arg0: i32) -> (i32, i32, i32) {
    %c0_i32 = arith.constant 0 : i32
    %c0_i32_0 = arith.constant 0 : i32
    %c0_i32_1 = arith.constant 0 : i32
    return %arg0, %c0_i32, %c0_i32_0 : i32, i32, i32
  }
  func.func @transform_1(%arg0: i32) -> (i32, i32) {
    %c0_i32 = arith.constant 0 : i32
    %c0_i32_0 = arith.constant 0 : i32
    %c0_i32_1 = arith.constant 0 : i32
    return %c0_i32, %c0_i32_0 : i32, i32
  }
  func.func @transform_2(%arg0: i32) -> (i32, i32) {
    %c0_i32 = arith.constant 0 : i32
    %c0_i32_0 = arith.constant 0 : i32
    %c0_i32_1 = arith.constant 0 : i32
    return %c0_i32, %c0_i32_0 : i32, i32
  }
  func.func @transform_3(%arg0: i32) -> (i32, i32) {
    %c0_i32 = arith.constant 0 : i32
    %c0_i32_0 = arith.constant 0 : i32
    %c0_i32_1 = arith.constant 0 : i32
    return %c0_i32, %c0_i32_0 : i32, i32
  }
  func.func @transform_4(%arg0: i32) -> (i32, i32, i32) {
    %c0_i32 = arith.constant 0 : i32
    %c0_i32_0 = arith.constant 0 : i32
    %c0_i32_1 = arith.constant 0 : i32
    return %arg0, %c0_i32, %c0_i32_0 : i32, i32, i32
  }
}

module attributes {stable_mosaic.version = 11 : i64} {
  func.func @_ctg_kernel(%arg0: i32, %arg1: memref<1x4x128xf32, #tpu.memory_space<vmem>>, %arg2: memref<128x128xf32, #tpu.memory_space<vmem>>, %arg3: memref<8x4xf32, #tpu.memory_space<vmem>>, %arg4: memref<8x128xf32, #tpu.memory_space<vmem>>, %arg5: memref<1x8x128xf32, #tpu.memory_space<vmem>>) attributes {dimension_semantics = [#tpu.dimension_semantics<parallel>], iteration_bounds = array<i64: 2>, scalar_prefetch = 0 : i64, scratch_operands = 0 : i64, tpu.core_type = #tpu.core_type<tc>, window_params = [{transform_indices = @transform_0, window_bounds = array<i64: 1, 4, 128>}, {pipeline_mode = #tpu.pipeline_mode<synchronous>, transform_indices = @transform_1, window_bounds = array<i64: 128, 128>}, {pipeline_mode = #tpu.pipeline_mode<synchronous>, transform_indices = @transform_2, window_bounds = array<i64: 8, 4>}, {pipeline_mode = #tpu.pipeline_mode<synchronous>, transform_indices = @transform_3, window_bounds = array<i64: 8, 128>}, {transform_indices = @transform_4, window_bounds = array<i64: 1, 8, 128>}]} {
    %c0 = arith.constant 0 : index
    %c0_0 = arith.constant 0 : index
    %c0_1 = arith.constant 0 : index
    %0 = vector.load %arg1[%c0, %c0_0, %c0_1] : memref<1x4x128xf32, #tpu.memory_space<vmem>>, vector<1x4x128xf32>
    %1 = vector.shape_cast %0 : vector<1x4x128xf32> to vector<4x128xf32>
    %c0_2 = arith.constant 0 : index
    %c0_3 = arith.constant 0 : index
    %2 = vector.load %arg2[%c0_2, %c0_3] : memref<128x128xf32, #tpu.memory_space<vmem>>, vector<128x128xf32>
    %cst = arith.constant dense<0.000000e+00> : vector<4x128xf32>
    %3 = tpu.matmul %1, %2, %cst {dimension_numbers = #tpu.dot_dimension_numbers<[1], [0], [0], [1], [0, 0, 1, 1], [], []>} : vector<4x128xf32>, vector<128x128xf32>, vector<4x128xf32> -> vector<4x128xf32>
    %4 = vector.shape_cast %3 : vector<4x128xf32> to vector<1x4x128xf32>
    %c0_4 = arith.constant 0 : index
    %c0_5 = arith.constant 0 : index
    %5 = vector.load %arg3[%c0_4, %c0_5] : memref<8x4xf32, #tpu.memory_space<vmem>>, vector<8x4xf32>
    %6 = vector.shape_cast %5 : vector<8x4xf32> to vector<1x8x4xf32>
    %cst_6 = arith.constant dense<0.000000e+00> : vector<1x8x128xf32>
    %7 = tpu.matmul %6, %4, %cst_6 {dimension_numbers = #tpu.dot_dimension_numbers<[2], [1], [1], [2], [0, 0, 0, 1, 1, 2], [0], [0]>} : vector<1x8x4xf32>, vector<1x4x128xf32>, vector<1x8x128xf32> -> vector<1x8x128xf32>
    %c0_7 = arith.constant 0 : index
    %c0_8 = arith.constant 0 : index
    %8 = vector.load %arg4[%c0_7, %c0_8] : memref<8x128xf32, #tpu.memory_space<vmem>>, vector<8x128xf32>
    %9 = vector.shape_cast %8 : vector<8x128xf32> to vector<1x8x128xf32>
    %10 = arith.addf %7, %9 : vector<1x8x128xf32>
    %c0_9 = arith.constant 0 : index
    %c0_10 = arith.constant 0 : index
    %c0_11 = arith.constant 0 : index
    %11 = vector.load %arg5[%c0_9, %c0_10, %c0_11] : memref<1x8x128xf32, #tpu.memory_space<vmem>>, vector<1x8x128xf32>
    tpu.vector_store %arg5[%c0_9, %c0_10, %c0_11], %10 {strides = array<i32>} : memref<1x8x128xf32, #tpu.memory_space<vmem>>, vector<1x8x128xf32>,
    return
  }
  func.func @transform_0(%arg0: i32) -> (i32, i32, i32) {
    %c0_i32 = arith.constant 0 : i32
    %c0_i32_0 = arith.constant 0 : i32
    %c0_i32_1 = arith.constant 0 : i32
    return %arg0, %c0_i32, %c0_i32_0 : i32, i32, i32
  }
  func.func @transform_1(%arg0: i32) -> (i32, i32) {
    %c0_i32 = arith.constant 0 : i32
    %c0_i32_0 = arith.constant 0 : i32
    %c0_i32_1 = arith.constant 0 : i32
    return %c0_i32, %c0_i32_0 : i32, i32
  }
  func.func @transform_2(%arg0: i32) -> (i32, i32) {
    %c0_i32 = arith.constant 0 : i32
    %c0_i32_0 = arith.constant 0 : i32
    %c0_i32_1 = arith.constant 0 : i32
    return %c0_i32, %c0_i32_0 : i32, i32
  }
  func.func @transform_3(%arg0: i32) -> (i32, i32) {
    %c0_i32 = arith.constant 0 : i32
    %c0_i32_0 = arith.constant 0 : i32
    %c0_i32_1 = arith.constant 0 : i32
    return %c0_i32, %c0_i32_0 : i32, i32
  }
  func.func @transform_4(%arg0: i32) -> (i32, i32, i32) {
    %c0_i32 = arith.constant 0 : i32
    %c0_i32_0 = arith.constant 0 : i32
    %c0_i32_1 = arith.constant 0 : i32
    return %arg0, %c0_i32, %c0_i32_0 : i32, i32, i32
  }
}

</mosaic_0001>

<bundles_post_ra>
// kernel: tpu_custom_call.1
= control target key start
LH: loop header
LB: loop body
LE: loop exit
PB: predicated region body
PF: predicated region fallthrough
CT: control target
= control target key end

     0   :  { %9 = vsyncpa [#allocation3], 0  ;;  %s882_s0 = inlined_call_operand.vmem [shape: f32[2,4,128], index: 0, kind: input, shape index: {}]   ;;  %s883_s1 = inlined_call_operand.hbm [shape: f32[128,128], index: 1, kind: input, shape index: {}]   ;;  %s884_s2 = inlined_call_operand.vmem [shape: f32[8,4], index: 2, kind: input, shape index: {}]   ;;  %s885_s3 = inlined_call_operand.vmem [shape: f32[8,128], index: 3, kind: input, shape index: {}]   ;;  %s886_s4 = inlined_call_operand.hbm [shape: f32[2,8,128], index: 4, kind: output, shape index: {}]  }
   0x1   :  { %10 = vsyncpa [#allocation4], 0 }
   0x2   :  { %12 = vsyncpa [#allocation4 + $0x1], 0  ;;  %s741_s15 = smov 0   ;;  %s743_s16 = smov 0  }
   0x3   :  { %s745_s17 = smov 0   ;;  %s747_s18 = smov 0  }
   0x4 LB: > { %s762_s19 = sadd.s32 4294967295, %s707_s18   ;;  %s461_s20 = sadd.s32 4294967294, %s707_s18   ;;  %s707_s18 = sphi %s747_s18, %s902_s18   ;;  %s703_s17 = sphi %s745_s17, %s901_s17   ;;  %s699_s16 = sphi %s743_s16, %s900_s16   ;;  %s695_s15 = sphi %s741_s15, %s899_s15  }
   0x5   : > { %s766_s21 = sadd.s32 1, %s707_s18   ;;  %s114_s22 = sadd.s32 1, %s703_s17 }
   0x6   : > { %s111_s23 = ssub.s32 %s707_s18, %s766_s21  ;;  %p124_p0 = scmp.ne.s32.totalorder %s703_s17, %s699_s16 }
   0x7   : > { %p112_p1 = scmp.eq.s32.totalorder %s111_s23, 0  ;;  %p125_p2 = scmp.eq.s32.totalorder %s762_s19, 1 }
   0x8   : > { %p130_p3 = scmp.ne.s32.totalorder %s699_s16, %s695_s15  ;;  %p131_p4 = scmp.eq.s32.totalorder %s461_s20, 1 }
   0x9   : > { %s777_s24 = scalar_select %p112_p1, %s703_s17, %s114_s22  }
   0xa   : > { %p779_p5 = por %p125_p2, %p124_p0  ;;  %p783_p6 = por %p131_p4, %p130_p3 }
   0xb   : > { %p462_p7 = scmp.ge.s32.totalorder %s707_s18, 1  ;;  %p138_p8 = scmp.lt.s32.totalorder %s707_s18, 3 }
   0xc   : > { %s890_s25 = scalar_select %p779_p5, 1, 0 }
   0xd   : > { %s891_s26 = scalar_select %p783_p6, 1, 0 }
   0xe   : > { %p887_p9 = scmp.eq.s32.totalorder %s762_s19, 0  ;;  %p790_p10 = pnand %p462_p7, %p138_p8 }
   0xf   : > { %s709_s28 = smov [#allocation2]   ;;  %s613_s7 = scalar_lea.hbm %s883_s1, 2048 }
  0x10   : > { %s892_s27 = scalar_select %p790_p10, 1, 0 }
  0x11   : > { %s150_s29 = sshll.u32 %s709_s28, 4  ;;  %p564_p11 = pneg %p790_p10  ;;  %s151_s29 = int_to_ptr.vmem [resolvable:$true] %s150_s29 }
  0x12   : > { %p614_p13 = scmp.ne.s32.totalorder %s883_s1, %s613_s7  ;;  %p620_p3 = scmp.lt.u32.totalorder %s613_s7, %s883_s1 }
  0x13   : > { %p798_p12 = pnand %p887_p9, %p564_p11 }
  0x15   : > { %p615_p0 = pneg %p798_p12 }
  0x17   : > { %p616_p1 = pnand %p615_p0, %p614_p13 }
  0x19   : > { %p617_p2 = pneg %p616_p1 }
  0x1b   : > { %p622_p4 = pnand %p620_p3, %p617_p2 }
  0x1d   : > { %625 = shalt.err (!%p622_p4)
}
  0x1e   : > { %s626_s12 = scalar_lea.vmem %s151_s29, 2048  ;;  %p634_p9 = scmp.lt.s32.totalorder %s151_s29, %s151_s29 }
  0x1f   : > { %p627_p7 = scmp.ne.s32.totalorder %s151_s29, %s626_s12  ;;  %p635_p6 = scmp.lt.s32.totalorder %s626_s12, %s626_s12 }
  0x21   : > { %p629_p8 = pnand %p627_p7, %p615_p0  ;;  %p636_p5 = por %p635_p6, %p634_p9 }
  0x23   : > { %p630_p11 = pneg %p629_p8 }
  0x25   : > { %p637_p10 = pnand %p636_p5, %p630_p11 }
  0x27   : > { %640 = shalt.err (!%p637_p10)
}
  0x28   : > { %s710_s13 = smov 128   ;;  %s711_s14 = smov 8  }
  0x29   : > { %567 = dma.hbm_to_vmem [thread:$0]  (!%p798_p12), %s883_s1, 2048, %s151_s29, [#allocation3], %s710_s13, %s710_s13, %s711_s14  }
  0x2a   : > { %p894_p13 = scmp.ne.s32.totalorder %s892_s27, 0 }
  0x2b   : > { %p895_p1 = scmp.eq.s32.totalorder (!%p894_p13), %s762_s19, 0 }
  0x2c   : > { %179 = sbr.rel (%p894_p13) target bundleno = 527 (0x20f), region = 36 }
  0x33   : > { %686 = dma.done.wait (%p895_p1), [#allocation3], 2048   ;;  %p896_p0 = pmov %p895_p1 }
  0x34   : > { %v712_v0 = vmov 0.0|0.0   ;;  %vm713_vm0 = vmmov 0   ;;  %v714_v1 = vmov 0.0   ;;  %v209_v2 = vld [vmem:[#allocation2] sm:$0xff]  ;;  %v210_v3 = vld [vmem:[#allocation2 + $0x8] sm:$0xff]  ;;  %v211_v4 = vld [vmem:[#allocation2 + $0x10] sm:$0xff] }
  0x35   : > { %688 = vsyncadd (%p896_p0), [#allocation3], 4294965248  ;;  %534 = vmatprep.subr.bf16.mxu0 %v712_v0  ;;  %526 = vmatprep.mubr.msk.f32.mxu0 %vm713_vm0, %v714_v1  ;;  %v535_v5 = vpack.c.bf16 %v210_v3, %v209_v2  ;;  %v212_v6 = vld [vmem:[#allocation2 + $0x18] sm:$0xff]  ;;  %v213_v8 = vld [vmem:[#allocation2 + $0x20] sm:$0xff]  ;;  %p204_p5 = scmp.lt.s32.totalorder %s762_s19, 1  ;;  %vm301_vm1 = vcmask 1043456  }
  0x36   : > { %529 = vmatprep.subr.mxu1 %v714_v1  ;;  %531 = vmatprep.mubr.msk.f32.mxu1 %vm713_vm0, %v714_v1  ;;  %v538_v7 = vpack.c.bf16 %v212_v6, %v211_v4  ;;  %v214_v9 = vld [vmem:[#allocation2 + $0x28] sm:$0xff]  ;;  %v215_v11 = vld [vmem:[#allocation2 + $0x30] sm:$0xff]  ;;  %v216_v12 = vld [vmem:[#allocation2 + $0x38] sm:$0xff]  ;;  %vm297_vm2 = vcmask 31744   ;;  %s201_s7 = sand.u32 1, %s699_s16   ;;  %s472_s11 = sshll.u32 %s762_s19, 7 }
  0x37   : > { %536 = vmatpush3.bf16.msra.mxu0 %v535_v5  ;;  %v541_v10 = vpack.c.bf16 %v214_v9, %v213_v8  ;;  %v544_v13 = vpack.c.bf16 %v216_v12, %v215_v11  ;;  %v217_v14 = vld [vmem:[#allocation2 + $0x40] sm:$0xff]  ;;  %v218_v15 = vld [vmem:[#allocation2 + $0x48] sm:$0xff]  ;;  %v219_v17 = vld [vmem:[#allocation2 + $0x50] sm:$0xff]  ;;  %s205_s23 = scalar_select %p204_p5, %s762_s19, 1 }
  0x38   : > { %537 = vmatprep.subr.bf16.mxu0 %v712_v0  ;;  %v547_v16 = vpack.c.bf16 %v218_v15, %v217_v14  ;;  %v220_v18 = vld [vmem:[#allocation2 + $0x58] sm:$0xff]  ;;  %v221_v20 = vld [vmem:[#allocation2 + $0x60] sm:$0xff]  ;;  %v222_v21 = vld [vmem:[#allocation2 + $0x68] sm:$0xff]  ;;  %s467_s8 = sshll.u32 %s201_s7, 3  ;;  %s840_s22 = scalar_lea.hbm %s886_s4, %s472_s11 }
  0x39   : > { %v550_v19 = vpack.c.bf16 %v220_v18, %v219_v17  ;;  %v553_v22 = vpack.c.bf16 %v222_v21, %v221_v20  ;;  %v223_v23 = vld [vmem:[#allocation2 + $0x70] sm:$0xff]  ;;  %v224_v24 = vld [vmem:[#allocation2 + $0x78] sm:$0xff]  ;;  %s468_s27 = sshll.u32 %s205_s23, 2  ;;  %v295_v27 = vld [vmem:[%s884_s2] sm:$0xff]  ;;  %s203_s12 = scalar_lea.vmem [#allocation5], %s467_s8 }
  0x3a   : > { %v556_v25 = vpack.c.bf16 %v224_v24, %v223_v23  ;;  %s207_s30 = scalar_lea.vmem %s882_s0, %s468_s27  ;;  %v296_v30 = vld [vmem:[%s885_s3] sm:$0xff]  ;;  %s390_s13 = sshll.u32 %s203_s12, 4  ;;  %s842_s13 = int_to_ptr.vmem [resolvable:$true] %s390_s13 }
  0x3b   : > { %539 = vmatpush3.bf16.msra.mxu0 %v538_v7  ;;  %v208_v26 = vld [vmem:[%s207_s30] sm:$0xf]  ;;  %s377_s23 = scalar_lea.sflag [#allocation4], %s201_s7  ;;  %s641_s27 = scalar_lea.vmem %s842_s13, 128 }
  0x3c   : > { %540 = vmatprep.subr.bf16.mxu0 %v712_v0  ;;  %p642_p6 = scmp.ne.s32.totalorder %s842_s13, %s641_s27  ;;  %p897_p9 = scmp.ne.s32.totalorder %s890_s25, 0 }
  0x3d   : > { %s715_s19 = smov [#allocation5]  }
  0x3e   : > { %p643_p10 = pnand %p642_p6, %p897_p9  ;;  %s645_s28 = sshll.u32 %s715_s19, 4  ;;  %s646_s28 = int_to_ptr.vmem [resolvable:$false] %s645_s28 }
  0x3f   : > { %542 = vmatpush3.bf16.msra.mxu0 %v541_v10  ;;  %s647_s29 = scalar_lea.vmem %s646_s28, 256  ;;  %p648_p2 = scmp.lt.s32.totalorder %s842_s13, %s646_s28 }
  0x40   : > { %543 = vmatprep.subr.bf16.mxu0 %v712_v0  ;;  %p644_p12 = pneg %p643_p10  ;;  %p649_p3 = scmp.lt.s32.totalorder %s647_s29, %s641_s27 }
  0x42   : > { %p650_p4 = por %p649_p3, %p648_p2 }
  0x43   : > { %545 = vmatpush3.bf16.msra.mxu0 %v544_v13 }
  0x44   : > { %546 = vmatprep.subr.bf16.mxu0 %v712_v0  ;;  %p651_p7 = pnand %p650_p4, %p644_p12 }
  0x47   : > { %548 = vmatpush3.bf16.msra.mxu0 %v547_v16 }
  0x48   : > { %549 = vmatprep.subr.bf16.mxu0 %v712_v0 }
  0x4b   : > { %551 = vmatpush3.bf16.msra.mxu0 %v550_v19 }
  0x4c   : > { %552 = vmatprep.subr.bf16.mxu0 %v712_v0 }
  0x4f   : > { %554 = vmatpush3.bf16.msra.mxu0 %v553_v22 }
  0x50   : > { %555 = vmatprep.subr.bf16.mxu0 %v712_v0 }
  0x53   : > { %557 = vmatpush3.bf16.msra.mxu0 %v556_v25 }
  0x56   : > { %527 = vmatmul.mubr.f32.vlgmr.msra.gmra.mrb[0].mxu0 %v208_v26 }
 0x129   : > { %v291_v28 = vpop.f32.mrb[0].mxu0 }
 0x12a   : > { %v528_v29 = vpop.f32.mrb[1].mxu0  ;;  %530 = vmatpush3.msk.msra.mxu1 %vm301_vm1, %v291_v28 }
 0x12b   : > { %532 = vmatmul.mubr.msk.f32.vlgmr.msra.gmra.mrb[0].mxu1 %vm297_vm2, %v295_v27 }
 0x1fe   : > { %v371_v31 = vpop.f32.mrb[0].mxu1 }
 0x1ff   : > { %v372_v32 = vadd.f32 %v371_v31, %v296_v30  ;;  %v533_v33 = vpop.f32.mrb[1].mxu1 }
 0x201   : > { %375 = vst [vmem:[%s203_s12] sm:$0xff] %v372_v32 }
 0x202   : > { %654 = shalt.err (!%p651_p7)
}
 0x203   : > { %s655_s30 = scalar_lea.hbm %s840_s22, 128  ;;  %s659_s7 = scalar_lea.hbm %s886_s4, 256 }
 0x204   : > { %p656_p8 = scmp.ne.s32.totalorder %s840_s22, %s655_s30  ;;  %p660_p1 = scmp.lt.u32.totalorder %s840_s22, %s886_s4 }
 0x205   : > { %p661_p0 = scmp.lt.u32.totalorder %s659_s7, %s655_s30  ;;  %p663_p6 = scmp.lt.u32.totalorder %s655_s30, %s840_s22 }
 0x206   : > { %p657_p11 = pnand %p656_p8, %p897_p9 }
 0x207   : > { %p662_p5 = por %p661_p0, %p660_p1 }
 0x208   : > { %p658_p13 = pneg %p657_p11 }
 0x209   : > { %p664_p10 = por %p663_p6, %p662_p5 }
 0x20b   : > { %p665_p12 = pnand %p664_p10, %p658_p13 }
 0x20d   : > { %668 = shalt.err (!%p665_p12)
}
 0x20e   : > { %562 = dma.vmem_to_hbm [thread:$0]  (%p897_p9), %s842_s13, 128, %s840_s22, %s377_s23  }
 0x20f PF: > { %p574_p2 = scmp.ge.s32.totalorder %s707_s18, 2  ;;  %s402_s10 = sand.u32 1, %s695_s15  }
 0x210   : > { %p898_p3 = scmp.ne.s32.totalorder %s891_s26, 0  ;;  %s403_s11 = scalar_lea.sflag [#allocation4], %s402_s10 }
 0x212   : > { %p569_p4 = pnand %p574_p2, %p898_p3 }
 0x214   : > { %690 = dma.done.wait (!%p569_p4), %s403_s11, 128  }
 0x215   : > { %692 = vsyncadd (!%p569_p4), %s403_s11, 4294967168  ;;  %p15_p7 = scmp.ge.s32.totalorder %s766_s21, 4   ;;  %s899_s15 = smov %s699_s16 }
 0x216   : > { %s900_s16 = smov %s703_s17  ;;  %s901_s17 = smov %s777_s24 }
 0x217   : > { %s902_s18 = smov %s766_s21  ;;  %17 = sbr.rel (!%p15_p7) target bundleno = 4 (0x4), region = 76 }
 0x21e   :  { %408 = vsyncpa [#allocation3], 1 }
 0x21f   :  { %410 = vsyncpa [#allocation3 + $0x1], 1 }
 0x220   :  { %411 = vsyncpa [#allocation4], 1 }
 0x221   :  { %413 = vsyncpa [#allocation4 + $0x1], 1 }

// kernel: tpu_custom_call.1
= control target key start
LH: loop header
LB: loop body
LE: loop exit
PB: predicated region body
PF: predicated region fallthrough
CT: control target
= control target key end

     0   :  { %9 = vsyncpa [#allocation3], 0  ;;  %s882_s0 = inlined_call_operand.vmem [shape: f32[2,4,128], index: 0, kind: input, shape index: {}]   ;;  %s883_s1 = inlined_call_operand.hbm [shape: f32[128,128], index: 1, kind: input, shape index: {}]   ;;  %s884_s2 = inlined_call_operand.vmem [shape: f32[8,4], index: 2, kind: input, shape index: {}]   ;;  %s885_s3 = inlined_call_operand.vmem [shape: f32[8,128], index: 3, kind: input, shape index: {}]   ;;  %s886_s4 = inlined_call_operand.hbm [shape: f32[2,8,128], index: 4, kind: output, shape index: {}]  }
   0x1   :  { %10 = vsyncpa [#allocation4], 0 }
   0x2   :  { %12 = vsyncpa [#allocation4 + $0x1], 0  ;;  %s741_s15 = smov 0   ;;  %s743_s16 = smov 0  }
   0x3   :  { %s745_s17 = smov 0   ;;  %s747_s18 = smov 0  }
   0x4 LB: > { %s762_s19 = sadd.s32 4294967295, %s707_s18   ;;  %s461_s20 = sadd.s32 4294967294, %s707_s18   ;;  %s707_s18 = sphi %s747_s18, %s902_s18   ;;  %s703_s17 = sphi %s745_s17, %s901_s17   ;;  %s699_s16 = sphi %s743_s16, %s900_s16   ;;  %s695_s15 = sphi %s741_s15, %s899_s15  }
   0x5   : > { %s766_s21 = sadd.s32 1, %s707_s18   ;;  %s114_s22 = sadd.s32 1, %s703_s17 }
   0x6   : > { %s111_s23 = ssub.s32 %s707_s18, %s766_s21  ;;  %p124_p0 = scmp.ne.s32.totalorder %s703_s17, %s699_s16 }
   0x7   : > { %p112_p1 = scmp.eq.s32.totalorder %s111_s23, 0  ;;  %p125_p2 = scmp.eq.s32.totalorder %s762_s19, 1 }
   0x8   : > { %p130_p3 = scmp.ne.s32.totalorder %s699_s16, %s695_s15  ;;  %p131_p4 = scmp.eq.s32.totalorder %s461_s20, 1 }
   0x9   : > { %s777_s24 = scalar_select %p112_p1, %s703_s17, %s114_s22  }
   0xa   : > { %p779_p5 = por %p125_p2, %p124_p0  ;;  %p783_p6 = por %p131_p4, %p130_p3 }
   0xb   : > { %p462_p7 = scmp.ge.s32.totalorder %s707_s18, 1  ;;  %p138_p8 = scmp.lt.s32.totalorder %s707_s18, 3 }
   0xc   : > { %s890_s25 = scalar_select %p779_p5, 1, 0 }
   0xd   : > { %s891_s26 = scalar_select %p783_p6, 1, 0 }
   0xe   : > { %p887_p9 = scmp.eq.s32.totalorder %s762_s19, 0  ;;  %p790_p10 = pnand %p462_p7, %p138_p8 }
   0xf   : > { %s709_s28 = smov [#allocation2]   ;;  %s613_s7 = scalar_lea.hbm %s883_s1, 2048 }
  0x10   : > { %s892_s27 = scalar_select %p790_p10, 1, 0 }
  0x11   : > { %s150_s29 = sshll.u32 %s709_s28, 4  ;;  %p564_p11 = pneg %p790_p10  ;;  %s151_s29 = int_to_ptr.vmem [resolvable:$true] %s150_s29 }
  0x12   : > { %p614_p13 = scmp.ne.s32.totalorder %s883_s1, %s613_s7  ;;  %p620_p3 = scmp.lt.u32.totalorder %s613_s7, %s883_s1 }
  0x13   : > { %p798_p12 = pnand %p887_p9, %p564_p11 }
  0x15   : > { %p615_p0 = pneg %p798_p12 }
  0x17   : > { %p616_p1 = pnand %p615_p0, %p614_p13 }
  0x19   : > { %p617_p2 = pneg %p616_p1 }
  0x1b   : > { %p622_p4 = pnand %p620_p3, %p617_p2 }
  0x1d   : > { %625 = shalt.err (!%p622_p4)
}
  0x1e   : > { %s626_s12 = scalar_lea.vmem %s151_s29, 2048  ;;  %p634_p9 = scmp.lt.s32.totalorder %s151_s29, %s151_s29 }
  0x1f   : > { %p627_p7 = scmp.ne.s32.totalorder %s151_s29, %s626_s12  ;;  %p635_p6 = scmp.lt.s32.totalorder %s626_s12, %s626_s12 }
  0x21   : > { %p629_p8 = pnand %p627_p7, %p615_p0  ;;  %p636_p5 = por %p635_p6, %p634_p9 }
  0x23   : > { %p630_p11 = pneg %p629_p8 }
  0x25   : > { %p637_p10 = pnand %p636_p5, %p630_p11 }
  0x27   : > { %640 = shalt.err (!%p637_p10)
}
  0x28   : > { %s710_s13 = smov 128   ;;  %s711_s14 = smov 8  }
  0x29   : > { %567 = dma.hbm_to_vmem [thread:$0]  (!%p798_p12), %s883_s1, 2048, %s151_s29, [#allocation3], %s710_s13, %s710_s13, %s711_s14  }
  0x2a   : > { %p894_p13 = scmp.ne.s32.totalorder %s892_s27, 0 }
  0x2b   : > { %p895_p1 = scmp.eq.s32.totalorder (!%p894_p13), %s762_s19, 0 }
  0x2c   : > { %179 = sbr.rel (%p894_p13) target bundleno = 527 (0x20f), region = 36 }
  0x33   : > { %686 = dma.done.wait (%p895_p1), [#allocation3], 2048   ;;  %p896_p0 = pmov %p895_p1 }
  0x34   : > { %v712_v0 = vmov 0.0|0.0   ;;  %vm713_vm0 = vmmov 0   ;;  %v714_v1 = vmov 0.0   ;;  %v209_v2 = vld [vmem:[#allocation2] sm:$0xff]  ;;  %v210_v3 = vld [vmem:[#allocation2 + $0x8] sm:$0xff]  ;;  %v211_v4 = vld [vmem:[#allocation2 + $0x10] sm:$0xff] }
  0x35   : > { %688 = vsyncadd (%p896_p0), [#allocation3], 4294965248  ;;  %534 = vmatprep.subr.bf16.mxu0 %v712_v0  ;;  %526 = vmatprep.mubr.msk.f32.mxu0 %vm713_vm0, %v714_v1  ;;  %v535_v5 = vpack.c.bf16 %v210_v3, %v209_v2  ;;  %v212_v6 = vld [vmem:[#allocation2 + $0x18] sm:$0xff]  ;;  %v213_v8 = vld [vmem:[#allocation2 + $0x20] sm:$0xff]  ;;  %p204_p5 = scmp.lt.s32.totalorder %s762_s19, 1  ;;  %vm301_vm1 = vcmask 1043456  }
  0x36   : > { %529 = vmatprep.subr.mxu1 %v714_v1  ;;  %531 = vmatprep.mubr.msk.f32.mxu1 %vm713_vm0, %v714_v1  ;;  %v538_v7 = vpack.c.bf16 %v212_v6, %v211_v4  ;;  %v214_v9 = vld [vmem:[#allocation2 + $0x28] sm:$0xff]  ;;  %v215_v11 = vld [vmem:[#allocation2 + $0x30] sm:$0xff]  ;;  %v216_v12 = vld [vmem:[#allocation2 + $0x38] sm:$0xff]  ;;  %vm297_vm2 = vcmask 31744   ;;  %s201_s7 = sand.u32 1, %s699_s16   ;;  %s472_s11 = sshll.u32 %s762_s19, 7 }
  0x37   : > { %536 = vmatpush3.bf16.msra.mxu0 %v535_v5  ;;  %v541_v10 = vpack.c.bf16 %v214_v9, %v213_v8  ;;  %v544_v13 = vpack.c.bf16 %v216_v12, %v215_v11  ;;  %v217_v14 = vld [vmem:[#allocation2 + $0x40] sm:$0xff]  ;;  %v218_v15 = vld [vmem:[#allocation2 + $0x48] sm:$0xff]  ;;  %v219_v17 = vld [vmem:[#allocation2 + $0x50] sm:$0xff]  ;;  %s205_s23 = scalar_select %p204_p5, %s762_s19, 1 }
  0x38   : > { %537 = vmatprep.subr.bf16.mxu0 %v712_v0  ;;  %v547_v16 = vpack.c.bf16 %v218_v15, %v217_v14  ;;  %v220_v18 = vld [vmem:[#allocation2 + $0x58] sm:$0xff]  ;;  %v221_v20 = vld [vmem:[#allocation2 + $0x60] sm:$0xff]  ;;  %v222_v21 = vld [vmem:[#allocation2 + $0x68] sm:$0xff]  ;;  %s467_s8 = sshll.u32 %s201_s7, 3  ;;  %s840_s22 = scalar_lea.hbm %s886_s4, %s472_s11 }
  0x39   : > { %v550_v19 = vpack.c.bf16 %v220_v18, %v219_v17  ;;  %v553_v22 = vpack.c.bf16 %v222_v21, %v221_v20  ;;  %v223_v23 = vld [vmem:[#allocation2 + $0x70] sm:$0xff]  ;;  %v224_v24 = vld [vmem:[#allocation2 + $0x78] sm:$0xff]  ;;  %s468_s27 = sshll.u32 %s205_s23, 2  ;;  %v295_v27 = vld [vmem:[%s884_s2] sm:$0xff]  ;;  %s203_s12 = scalar_lea.vmem [#allocation5], %s467_s8 }
  0x3a   : > { %v556_v25 = vpack.c.bf16 %v224_v24, %v223_v23  ;;  %s207_s30 = scalar_lea.vmem %s882_s0, %s468_s27  ;;  %v296_v30 = vld [vmem:[%s885_s3] sm:$0xff]  ;;  %s390_s13 = sshll.u32 %s203_s12, 4  ;;  %s842_s13 = int_to_ptr.vmem [resolvable:$true] %s390_s13 }
  0x3b   : > { %539 = vmatpush3.bf16.msra.mxu0 %v538_v7  ;;  %v208_v26 = vld [vmem:[%s207_s30] sm:$0xf]  ;;  %s377_s23 = scalar_lea.sflag [#allocation4], %s201_s7  ;;  %s641_s27 = scalar_lea.vmem %s842_s13, 128 }
  0x3c   : > { %540 = vmatprep.subr.bf16.mxu0 %v712_v0  ;;  %p642_p6 = scmp.ne.s32.totalorder %s842_s13, %s641_s27  ;;  %p897_p9 = scmp.ne.s32.totalorder %s890_s25, 0 }
  0x3d   : > { %s715_s19 = smov [#allocation5]  }
  0x3e   : > { %p643_p10 = pnand %p642_p6, %p897_p9  ;;  %s645_s28 = sshll.u32 %s715_s19, 4  ;;  %s646_s28 = int_to_ptr.vmem [resolvable:$false] %s645_s28 }
  0x3f   : > { %542 = vmatpush3.bf16.msra.mxu0 %v541_v10  ;;  %s647_s29 = scalar_lea.vmem %s646_s28, 256  ;;  %p648_p2 = scmp.lt.s32.totalorder %s842_s13, %s646_s28 }
  0x40   : > { %543 = vmatprep.subr.bf16.mxu0 %v712_v0  ;;  %p644_p12 = pneg %p643_p10  ;;  %p649_p3 = scmp.lt.s32.totalorder %s647_s29, %s641_s27 }
  0x42   : > { %p650_p4 = por %p649_p3, %p648_p2 }
  0x43   : > { %545 = vmatpush3.bf16.msra.mxu0 %v544_v13 }
  0x44   : > { %546 = vmatprep.subr.bf16.mxu0 %v712_v0  ;;  %p651_p7 = pnand %p650_p4, %p644_p12 }
  0x47   : > { %548 = vmatpush3.bf16.msra.mxu0 %v547_v16 }
  0x48   : > { %549 = vmatprep.subr.bf16.mxu0 %v712_v0 }
  0x4b   : > { %551 = vmatpush3.bf16.msra.mxu0 %v550_v19 }
  0x4c   : > { %552 = vmatprep.subr.bf16.mxu0 %v712_v0 }
  0x4f   : > { %554 = vmatpush3.bf16.msra.mxu0 %v553_v22 }
  0x50   : > { %555 = vmatprep.subr.bf16.mxu0 %v712_v0 }
  0x53   : > { %557 = vmatpush3.bf16.msra.mxu0 %v556_v25 }
  0x56   : > { %527 = vmatmul.mubr.f32.vlgmr.msra.gmra.mrb[0].mxu0 %v208_v26 }
 0x129   : > { %v291_v28 = vpop.f32.mrb[0].mxu0 }
 0x12a   : > { %v528_v29 = vpop.f32.mrb[1].mxu0  ;;  %530 = vmatpush3.msk.msra.mxu1 %vm301_vm1, %v291_v28 }
 0x12b   : > { %532 = vmatmul.mubr.msk.f32.vlgmr.msra.gmra.mrb[0].mxu1 %vm297_vm2, %v295_v27 }
 0x1fe   : > { %v371_v31 = vpop.f32.mrb[0].mxu1 }
 0x1ff   : > { %v372_v32 = vadd.f32 %v371_v31, %v296_v30  ;;  %v533_v33 = vpop.f32.mrb[1].mxu1 }
 0x201   : > { %375 = vst [vmem:[%s203_s12] sm:$0xff] %v372_v32 }
 0x202   : > { %654 = shalt.err (!%p651_p7)
}
 0x203   : > { %s655_s30 = scalar_lea.hbm %s840_s22, 128  ;;  %s659_s7 = scalar_lea.hbm %s886_s4, 256 }
 0x204   : > { %p656_p8 = scmp.ne.s32.totalorder %s840_s22, %s655_s30  ;;  %p660_p1 = scmp.lt.u32.totalorder %s840_s22, %s886_s4 }
 0x205   : > { %p661_p0 = scmp.lt.u32.totalorder %s659_s7, %s655_s30  ;;  %p663_p6 = scmp.lt.u32.totalorder %s655_s30, %s840_s22 }
 0x206   : > { %p657_p11 = pnand %p656_p8, %p897_p9 }
 0x207   : > { %p662_p5 = por %p661_p0, %p660_p1 }
 0x208   : > { %p658_p13 = pneg %p657_p11 }
 0x209   : > { %p664_p10 = por %p663_p6, %p662_p5 }
 0x20b   : > { %p665_p12 = pnand %p664_p10, %p658_p13 }
 0x20d   : > { %668 = shalt.err (!%p665_p12)
}
 0x20e   : > { %562 = dma.vmem_to_hbm [thread:$0]  (%p897_p9), %s842_s13, 128, %s840_s22, %s377_s23  }
 0x20f PF: > { %p574_p2 = scmp.ge.s32.totalorder %s707_s18, 2  ;;  %s402_s10 = sand.u32 1, %s695_s15  }
 0x210   : > { %p898_p3 = scmp.ne.s32.totalorder %s891_s26, 0  ;;  %s403_s11 = scalar_lea.sflag [#allocation4], %s402_s10 }
 0x212   : > { %p569_p4 = pnand %p574_p2, %p898_p3 }
 0x214   : > { %690 = dma.done.wait (!%p569_p4), %s403_s11, 128  }
 0x215   : > { %692 = vsyncadd (!%p569_p4), %s403_s11, 4294967168  ;;  %p15_p7 = scmp.ge.s32.totalorder %s766_s21, 4   ;;  %s899_s15 = smov %s699_s16 }
 0x216   : > { %s900_s16 = smov %s703_s17  ;;  %s901_s17 = smov %s777_s24 }
 0x217   : > { %s902_s18 = smov %s766_s21  ;;  %17 = sbr.rel (!%p15_p7) target bundleno = 4 (0x4), region = 76 }
 0x21e   :  { %408 = vsyncpa [#allocation3], 1 }
 0x21f   :  { %410 = vsyncpa [#allocation3 + $0x1], 1 }
 0x220   :  { %411 = vsyncpa [#allocation4], 1 }
 0x221   :  { %413 = vsyncpa [#allocation4 + $0x1], 1 }

</bundles_post_ra>
